<compile_context>
chip_gen: v7x
topology: tpu7x:2x2x1
jax: 0.10.0
libtpu: 0.0.40
codegen_flags: <defaults>
</compile_context>

<pallas_src>
import functools

import jax
import jax.numpy as jnp
from jax import lax
from jax.experimental import pallas as pl
from jax.experimental.pallas import tpu as pltpu


# ----------------------------------------------------------------------------
# Kernel
# ----------------------------------------------------------------------------
def _soft_hgr_kernel(ft_ref, fa_ref, fv_ref, out_ref,
                     g_tt, g_aa, g_vv, g_ta, g_tv, g_av, rs_t, rs_a, rs_v,
                     *, d_orig, precision):
    k = pl.program_id(0)
    nk = pl.num_programs(0)
    n, block_d = ft_ref.shape

    @pl.when(k == 0)
    def _init():
        for ref in (g_tt, g_aa, g_vv, g_ta, g_tv, g_av, rs_t, rs_a, rs_v):
            ref[...] = jnp.zeros_like(ref)

    dn = (((1,), (1,)), ((), ()))  # contract the lane (feature) axis of both sides

    def dot_nt(a, b):
        return lax.dot_general(a, b, dn,
                               preferred_element_type=jnp.float32,
                               precision=precision)

    def accumulate(ft, fa, fv):
        # Pure-MXU body: self-Grams, cross-Grams (mapping) and row sums
        # (centering) are all lane-contracting matmuls with f32 accumulation.
        ones_row = jnp.ones((1, block_d), dtype=ft.dtype)
        g_tt[...] += dot_nt(ft, ft)
        g_aa[...] += dot_nt(fa, fa)
        g_vv[...] += dot_nt(fv, fv)
        g_ta[...] += dot_nt(ft, fa)
        g_tv[...] += dot_nt(ft, fv)
        g_av[...] += dot_nt(fa, fv)
        rs_t[...] += dot_nt(ft, ones_row)
        rs_a[...] += dot_nt(fa, ones_row)
        rs_v[...] += dot_nt(fv, ones_row)

    ft = ft_ref[...]
    fa = fa_ref[...]
    fv = fv_ref[...]

    # Columns of the last tile that are actually valid (static Python int).
    tail = d_orig % block_d
    if tail == 0:
        # Every tile is full: hot path, no masking anywhere.
        accumulate(ft, fa, fv)
    else:
        # Only the final grid step holds a ragged tile; the block's columns
        # beyond `tail` are undefined (no HBM padding was done), so zero them
        # with a lane-iota select before they reach the MXU.
        is_last = k == nk - 1

        @pl.when(k < nk - 1)
        def _full_tile():
            accumulate(ft, fa, fv)

        @pl.when(is_last)
        def _masked_tile():
            lane = lax.broadcasted_iota(jnp.int32, (n, block_d), 1)
            valid = lane < tail
            accumulate(jnp.where(valid, ft, jnp.zeros_like(ft)),
                       jnp.where(valid, fa, jnp.zeros_like(fa)),
                       jnp.where(valid, fv, jnp.zeros_like(fv)))

    @pl.when(k == nk - 1)
    def _finalize():
        inv_d = 1.0 / d_orig
        denom = d_orig - 1
        # d == 1 degenerates exactly as torch.cov does (nan) without failing
        # at trace time.
        inv_dm1 = (1.0 / denom) if denom > 0 else float("nan")
        inv_n = 1.0 / n

        # mapping_raw = sum_pairs trace(X_i @ X_j^T) = sum of cross-Gram diagonals.
        rix = lax.broadcasted_iota(jnp.int32, (n, n), 0)
        cix = lax.broadcasted_iota(jnp.int32, (n, n), 1)
        cross_sum = g_ta[...] + g_tv[...] + g_av[...]
        mapping_raw = jnp.sum(jnp.where(rix == cix, cross_sum, 0.0))

        # Centered Gram: Xc @ Xc^T = X @ X^T - (s s^T) / D.  The rank-1 outer
        # product runs once; a K=1 dot_general is kept here because the VPU
        # broadcast alternative needs an (N,1)->(1,N) relayout of similar
        # one-time cost.
        def centered(g_ref, s_ref):
            s = s_ref[...]
            outer = lax.dot_general(s, s, dn,
                                    preferred_element_type=jnp.float32,
                                    precision=lax.Precision.HIGHEST)
            return g_ref[...] - outer * inv_d

        ct = centered(g_tt, rs_t)
        ca = centered(g_aa, rs_a)
        cv = centered(g_vv, rs_v)

        # sum_pairs trace(cov_i @ cov_j)  (cov matrices are symmetric)
        cov_raw = jnp.sum(ct * ca + ct * cv + ca * cv)

        total = (mapping_raw - 0.5 * cov_raw * inv_dm1 * inv_dm1) * inv_n
        out_ref[0] = -total * inv_n


# ----------------------------------------------------------------------------
# Wrapper: device-aware tiling / VMEM budgeting
# ----------------------------------------------------------------------------
def _round_up(x, m):
    return ((x + m - 1) // m) * m


def _vmem_capacity_bytes():
    """Per-TensorCore VMEM capacity; conservative 64 MiB (v7x) if unknown."""
    try:
        info = pltpu.get_tpu_info()
        cap = getattr(info, "vmem_capacity_bytes", None)
        if cap:
            return int(cap)
    except Exception:
        pass
    return 64 * 1024 * 1024


def _scratch_vmem_bytes(n):
    # 6 (N,N) Gram accumulators + 3 (N,1) row sums, f32, with (8,128) padding.
    n8 = _round_up(max(n, 1), 8)
    n128 = _round_up(max(n, 1), 128)
    return 6 * n8 * n128 * 4 + 3 * n8 * 128 * 4


def _pick_tile_d(n, d, itemsize, input_budget_bytes):
    """Widest D tile (multiple of 256 when tiling) fitting the input budget.

    Pallas double-buffers every input block: 3 modalities x 2 buffers.  The
    tile width therefore scales inversely with N; there is no fixed 4K cap.
    """
    n_rows = _round_up(max(n, 1), 8)
    per_col = 3 * 2 * n_rows * itemsize
    if d * per_col <= input_budget_bytes:
        return d                                  # single block over full D
    max_cols = input_budget_bytes // per_col
    tile = max(256, (max_cols // 256) * 256)      # MXU depth multiple (v6e/v7x)
    tile = min(tile, 32768)                       # keep per-step DMA/code sane
    return min(tile, d)


def soft_hgr_loss(f_t, f_a, f_v, *, tile_d=None, precision=None,
                  vmem_headroom_bytes=8 * 1024 * 1024):
    """Pallas SoftHGR loss. Inputs: three [N, D] feature matrices -> scalar."""
    n, d = f_t.shape
    assert f_a.shape == (n, d) and f_v.shape == (n, d)
    assert f_t.dtype == f_a.dtype == f_v.dtype
    itemsize = jnp.dtype(f_t.dtype).itemsize

    if precision is None:
        # f32 inputs need the multi-pass MXU path to match an f32 reference;
        # bf16 inputs use the native single-pass MXU.
        precision = (lax.Precision.HIGHEST if itemsize >= 4
                     else lax.Precision.DEFAULT)

    capacity = _vmem_capacity_bytes()
    # Never ask the compiler for more VMEM than the part has (64 MiB/TC on
    # v7x, 128 MiB on v5e/v6e), minus headroom for compiler temporaries.
    vmem_ceiling = min(capacity - vmem_headroom_bytes, 112 * 1024 * 1024)
    scratch_bytes = _scratch_vmem_bytes(n)
    input_budget = vmem_ceiling - scratch_bytes - 4 * 1024 * 1024

    min_inputs = 3 * 2 * _round_up(n, 8) * 256 * itemsize
    if input_budget < min_inputs:
        raise ValueError(
            f"N={n}: {scratch_bytes / 2**20:.1f} MiB of Gram scratch leaves no "
            f"room for input tiles in {vmem_ceiling / 2**20:.0f} MiB of VMEM. "
            "TODO(synk): tile N or use the DxD cross-Gram orientation.")

    if tile_d is None:
        tile_d = _pick_tile_d(n, d, itemsize, input_budget)
    tile_d = min(int(tile_d), d)
    if tile_d < d and tile_d % 128 != 0:
        raise ValueError("tile_d must be a multiple of 128 when it tiles D")

    needed = (3 * 2 * _round_up(n, 8) * tile_d * itemsize
              + scratch_bytes + 4 * 1024 * 1024)
    if needed > vmem_ceiling:
        raise ValueError(
            f"tile_d={tile_d} needs ~{needed / 2**20:.1f} MiB of VMEM but the "
            f"device budget is {vmem_ceiling / 2**20:.0f} MiB; reduce tile_d.")
    vmem_limit = int(min(max(needed, 32 * 1024 * 1024), vmem_ceiling))

    num_k = pl.cdiv(d, tile_d)
    kernel = functools.partial(_soft_hgr_kernel, d_orig=d, precision=precision)

    grid_spec = pltpu.PrefetchScalarGridSpec(
        num_scalar_prefetch=0,
        grid=(num_k,),
        in_specs=[pl.BlockSpec((n, tile_d), lambda k: (0, k))] * 3,
        out_specs=pl.BlockSpec(memory_space=pltpu.MemorySpace.SMEM),
        scratch_shapes=(
            [pltpu.VMEM((n, n), jnp.float32)] * 6    # self + cross Grams
            + [pltpu.VMEM((n, 1), jnp.float32)] * 3  # row sums
        ),
    )

    flops = 12 * n * n * d + 6 * n * d + 15 * n * n
    bytes_accessed = 3 * n * d * itemsize + 4

    out = pl.pallas_call(
        kernel,
        out_shape=jax.ShapeDtypeStruct((1,), jnp.float32),
        grid_spec=grid_spec,
        compiler_params=pltpu.CompilerParams(
            dimension_semantics=("arbitrary",),   # D axis carries accumulators
            vmem_limit_bytes=vmem_limit,
        ),
        cost_estimate=pl.CostEstimate(
            flops=int(flops), transcendentals=0,
            bytes_accessed=int(bytes_accessed)),
    )(f_t, f_a, f_v)
    return out[0]


# ----------------------------------------------------------------------------
# Pure-JAX reference mirroring the PyTorch module
# ----------------------------------------------------------------------------
def _reference_loss(f_t, f_a, f_v):
    hi = lax.Precision.HIGHEST
    feats = [f.astype(jnp.float32) for f in (f_t, f_a, f_v)]
    n = f_t.shape[0]

    def cov(x):
        xc = x - jnp.mean(x, axis=1, keepdims=True)
        return jnp.matmul(xc, xc.T, precision=hi) / (x.shape[1] - 1)

    total = 0.0
    for i in range(len(feats) - 1):
        for j in range(i + 1, len(feats)):
            mapping = jnp.mean(jnp.sum(feats[i] * feats[j], axis=-1), axis=0)
            cov_ij = jnp.trace(
                jnp.matmul(cov(feats[i]), cov(feats[j]), precision=hi)) / n
            total = total + (mapping - cov_ij / 2.0)
    return -total / n


if __name__ == "__main__":
    key = jax.random.PRNGKey(0)
    k_t, k_a, k_v = jax.random.split(key, 3)

    # Case 1: single-block path (full D fits in one block).
    N, D = 8, 32
    f_t = jax.random.normal(k_t, (N, D), dtype=jnp.float32)
    f_a = jax.random.normal(k_a, (N, D), dtype=jnp.float32)
    f_v = jax.random.normal(k_v, (N, D), dtype=jnp.float32)
    loss = jax.block_until_ready(soft_hgr_loss(f_t, f_a, f_v))
    ref = jax.block_until_ready(_reference_loss(f_t, f_a, f_v))
    assert jnp.allclose(loss, ref, rtol=1e-3, atol=1e-4), (loss, ref)

    # Case 2: streamed grid with a ragged last tile masked in-kernel
    # (D=384 with tile_d=256 -> grid of 2, last block only half valid;
    #  no HBM padding copies are made).
    N2, D2 = 8, 384
    g_t = jax.random.normal(k_t, (N2, D2), dtype=jnp.float32)
    g_a = jax.random.normal(k_a, (N2, D2), dtype=jnp.float32)
    g_v = jax.random.normal(k_v, (N2, D2), dtype=jnp.float32)
    loss2 = jax.block_until_ready(soft_hgr_loss(g_t, g_a, g_v, tile_d=256))
    ref2 = jax.block_until_ready(_reference_loss(g_t, g_a, g_v))
    assert jnp.allclose(loss2, ref2, rtol=1e-3, atol=1e-4), (loss2, ref2)

    print("KERNEL_OK")
</pallas_src>

<mosaic_0001>
module attributes {stable_mosaic.version = 11 : i64} {
  func.func @_soft_hgr_kernel(%arg0: i32, %arg1: memref<8x32xf32, #tpu.memory_space<vmem>>, %arg2: memref<8x32xf32, #tpu.memory_space<vmem>>, %arg3: memref<8x32xf32, #tpu.memory_space<vmem>>, %arg4: memref<1xf32, #tpu.memory_space<smem>>, %arg5: memref<8x8xf32, #tpu.memory_space<vmem>>, %arg6: memref<8x8xf32, #tpu.memory_space<vmem>>, %arg7: memref<8x8xf32, #tpu.memory_space<vmem>>, %arg8: memref<8x8xf32, #tpu.memory_space<vmem>>, %arg9: memref<8x8xf32, #tpu.memory_space<vmem>>, %arg10: memref<8x8xf32, #tpu.memory_space<vmem>>, %arg11: memref<8x1xf32, #tpu.memory_space<vmem>>, %arg12: memref<8x1xf32, #tpu.memory_space<vmem>>, %arg13: memref<8x1xf32, #tpu.memory_space<vmem>>) attributes {dimension_semantics = [#tpu.dimension_semantics<arbitrary>], iteration_bounds = array<i64: 1>, scalar_prefetch = 0 : i64, scratch_operands = 9 : i64, tpu.core_type = #tpu.core_type<tc>, window_params = [{transform_indices = @transform_0, window_bounds = array<i64: 8, 32>}, {transform_indices = @transform_1, window_bounds = array<i64: 8, 32>}, {transform_indices = @transform_2, window_bounds = array<i64: 8, 32>}, {transform_indices = @transform_3, window_bounds = array<i64: 1>}]} {
    %c0_i32 = arith.constant 0 : i32
    %0 = arith.cmpi eq, %arg0, %c0_i32 : i32
    %1 = arith.extui %0 : i1 to i32
    %c0_i32_0 = arith.constant 0 : i32
    %2 = arith.cmpi ne, %1, %c0_i32_0 : i32
    scf.if %2 {
      %cst_53 = arith.constant 0.000000e+00 : f32
      %46 = vector.broadcast %cst_53 : f32 to vector<8x8xf32>
      %c0_54 = arith.constant 0 : index
      %c0_55 = arith.constant 0 : index
      %47 = vector.load %arg5[%c0_54, %c0_55] : memref<8x8xf32, #tpu.memory_space<vmem>>, vector<8x8xf32>
      tpu.vector_store %arg5[%c0_54, %c0_55], %46 {strides = array<i32>} : memref<8x8xf32, #tpu.memory_space<vmem>>, vector<8x8xf32>,
      %cst_56 = arith.constant 0.000000e+00 : f32
      %48 = vector.broadcast %cst_56 : f32 to vector<8x8xf32>
      %c0_57 = arith.constant 0 : index
      %c0_58 = arith.constant 0 : index
      %49 = vector.load %arg6[%c0_57, %c0_58] : memref<8x8xf32, #tpu.memory_space<vmem>>, vector<8x8xf32>
      tpu.vector_store %arg6[%c0_57, %c0_58], %48 {strides = array<i32>} : memref<8x8xf32, #tpu.memory_space<vmem>>, vector<8x8xf32>,
      %cst_59 = arith.constant 0.000000e+00 : f32
      %50 = vector.broadcast %cst_59 : f32 to vector<8x8xf32>
      %c0_60 = arith.constant 0 : index
      %c0_61 = arith.constant 0 : index
      %51 = vector.load %arg7[%c0_60, %c0_61] : memref<8x8xf32, #tpu.memory_space<vmem>>, vector<8x8xf32>
      tpu.vector_store %arg7[%c0_60, %c0_61], %50 {strides = array<i32>} : memref<8x8xf32, #tpu.memory_space<vmem>>, vector<8x8xf32>,
      %cst_62 = arith.constant 0.000000e+00 : f32
      %52 = vector.broadcast %cst_62 : f32 to vector<8x8xf32>
      %c0_63 = arith.constant 0 : index
      %c0_64 = arith.constant 0 : index
      %53 = vector.load %arg8[%c0_63, %c0_64] : memref<8x8xf32, #tpu.memory_space<vmem>>, vector<8x8xf32>
      tpu.vector_store %arg8[%c0_63, %c0_64], %52 {strides = array<i32>} : memref<8x8xf32, #tpu.memory_space<vmem>>, vector<8x8xf32>,
      %cst_65 = arith.constant 0.000000e+00 : f32
      %54 = vector.broadcast %cst_65 : f32 to vector<8x8xf32>
      %c0_66 = arith.constant 0 : index
      %c0_67 = arith.constant 0 : index
      %55 = vector.load %arg9[%c0_66, %c0_67] : memref<8x8xf32, #tpu.memory_space<vmem>>, vector<8x8xf32>
      tpu.vector_store %arg9[%c0_66, %c0_67], %54 {strides = array<i32>} : memref<8x8xf32, #tpu.memory_space<vmem>>, vector<8x8xf32>,
      %cst_68 = arith.constant 0.000000e+00 : f32
      %56 = vector.broadcast %cst_68 : f32 to vector<8x8xf32>
      %c0_69 = arith.constant 0 : index
      %c0_70 = arith.constant 0 : index
      %57 = vector.load %arg10[%c0_69, %c0_70] : memref<8x8xf32, #tpu.memory_space<vmem>>, vector<8x8xf32>
      tpu.vector_store %arg10[%c0_69, %c0_70], %56 {strides = array<i32>} : memref<8x8xf32, #tpu.memory_space<vmem>>, vector<8x8xf32>,
      %cst_71 = arith.constant 0.000000e+00 : f32
      %58 = vector.broadcast %cst_71 : f32 to vector<8x1xf32>
      %c0_72 = arith.constant 0 : index
      %c0_73 = arith.constant 0 : index
      %59 = vector.load %arg11[%c0_72, %c0_73] : memref<8x1xf32, #tpu.memory_space<vmem>>, vector<8x1xf32>
      tpu.vector_store %arg11[%c0_72, %c0_73], %58 {strides = array<i32>} : memref<8x1xf32, #tpu.memory_space<vmem>>, vector<8x1xf32>,
      %cst_74 = arith.constant 0.000000e+00 : f32
      %60 = vector.broadcast %cst_74 : f32 to vector<8x1xf32>
      %c0_75 = arith.constant 0 : index
      %c0_76 = arith.constant 0 : index
      %61 = vector.load %arg12[%c0_75, %c0_76] : memref<8x1xf32, #tpu.memory_space<vmem>>, vector<8x1xf32>
      tpu.vector_store %arg12[%c0_75, %c0_76], %60 {strides = array<i32>} : memref<8x1xf32, #tpu.memory_space<vmem>>, vector<8x1xf32>,
      %cst_77 = arith.constant 0.000000e+00 : f32
      %62 = vector.broadcast %cst_77 : f32 to vector<8x1xf32>
      %c0_78 = arith.constant 0 : index
      %c0_79 = arith.constant 0 : index
      %63 = vector.load %arg13[%c0_78, %c0_79] : memref<8x1xf32, #tpu.memory_space<vmem>>, vector<8x1xf32>
      tpu.vector_store %arg13[%c0_78, %c0_79], %62 {strides = array<i32>} : memref<8x1xf32, #tpu.memory_space<vmem>>, vector<8x1xf32>,
    } else {
    }
    %c0 = arith.constant 0 : index
    %c0_1 = arith.constant 0 : index
    %3 = vector.load %arg1[%c0, %c0_1] : memref<8x32xf32, #tpu.memory_space<vmem>>, vector<8x32xf32>
    %c0_2 = arith.constant 0 : index
    %c0_3 = arith.constant 0 : index
    %4 = vector.load %arg2[%c0_2, %c0_3] : memref<8x32xf32, #tpu.memory_space<vmem>>, vector<8x32xf32>
    %c0_4 = arith.constant 0 : index
    %c0_5 = arith.constant 0 : index
    %5 = vector.load %arg3[%c0_4, %c0_5] : memref<8x32xf32, #tpu.memory_space<vmem>>, vector<8x32xf32>
    %cst = arith.constant 1.000000e+00 : f32
    %6 = vector.broadcast %cst : f32 to vector<1x32xf32>
    %c0_6 = arith.constant 0 : index
    %c0_7 = arith.constant 0 : index
    %7 = vector.load %arg5[%c0_6, %c0_7] : memref<8x8xf32, #tpu.memory_space<vmem>>, vector<8x8xf32>
    %cst_8 = arith.constant dense<0.000000e+00> : vector<8x8xf32>
    %8 = tpu.matmul %3, %3, %cst_8 {dimension_numbers = #tpu.dot_dimension_numbers<[1], [1], [0], [0], [0, 0, 1, 0], [], []>, precision = #tpu.contract_precision<fp32>} : vector<8x32xf32>, vector<8x32xf32>, vector<8x8xf32> -> vector<8x8xf32>
    %9 = arith.addf %7, %8 : vector<8x8xf32>
    %c0_9 = arith.constant 0 : index
    %c0_10 = arith.constant 0 : index
    %10 = vector.load %arg5[%c0_9, %c0_10] : memref<8x8xf32, #tpu.memory_space<vmem>>, vector<8x8xf32>
    tpu.vector_store %arg5[%c0_9, %c0_10], %9 {strides = array<i32>} : memref<8x8xf32, #tpu.memory_space<vmem>>, vector<8x8xf32>,
    %c0_11 = arith.constant 0 : index
    %c0_12 = arith.constant 0 : index
    %11 = vector.load %arg6[%c0_11, %c0_12] : memref<8x8xf32, #tpu.memory_space<vmem>>, vector<8x8xf32>
    %cst_13 = arith.constant dense<0.000000e+00> : vector<8x8xf32>
    %12 = tpu.matmul %4, %4, %cst_13 {dimension_numbers = #tpu.dot_dimension_numbers<[1], [1], [0], [0], [0, 0, 1, 0], [], []>, precision = #tpu.contract_precision<fp32>} : vector<8x32xf32>, vector<8x32xf32>, vector<8x8xf32> -> vector<8x8xf32>
    %13 = arith.addf %11, %12 : vector<8x8xf32>
    %c0_14 = arith.constant 0 : index
    %c0_15 = arith.constant 0 : index
    %14 = vector.load %arg6[%c0_14, %c0_15] : memref<8x8xf32, #tpu.memory_space<vmem>>, vector<8x8xf32>
    tpu.vector_store %arg6[%c0_14, %c0_15], %13 {strides = array<i32>} : memref<8x8xf32, #tpu.memory_space<vmem>>, vector<8x8xf32>,
    %c0_16 = arith.constant 0 : index
    %c0_17 = arith.constant 0 : index
    %15 = vector.load %arg7[%c0_16, %c0_17] : memref<8x8xf32, #tpu.memory_space<vmem>>, vector<8x8xf32>
    %cst_18 = arith.constant dense<0.000000e+00> : vector<8x8xf32>
    %16 = tpu.matmul %5, %5, %cst_18 {dimension_numbers = #tpu.dot_dimension_numbers<[1], [1], [0], [0], [0, 0, 1, 0], [], []>, precision = #tpu.contract_precision<fp32>} : vector<8x32xf32>, vector<8x32xf32>, vector<8x8xf32> -> vector<8x8xf32>
    %17 = arith.addf %15, %16 : vector<8x8xf32>
    %c0_19 = arith.constant 0 : index
    %c0_20 = arith.constant 0 : index
    %18 = vector.load %arg7[%c0_19, %c0_20] : memref<8x8xf32, #tpu.memory_space<vmem>>, vector<8x8xf32>
    tpu.vector_store %arg7[%c0_19, %c0_20], %17 {strides = array<i32>} : memref<8x8xf32, #tpu.memory_space<vmem>>, vector<8x8xf32>,
    %c0_21 = arith.constant 0 : index
    %c0_22 = arith.constant 0 : index
    %19 = vector.load %arg8[%c0_21, %c0_22] : memref<8x8xf32, #tpu.memory_space<vmem>>, vector<8x8xf32>
    %cst_23 = arith.constant dense<0.000000e+00> : vector<8x8xf32>
    %20 = tpu.matmul %3, %4, %cst_23 {dimension_numbers = #tpu.dot_dimension_numbers<[1], [1], [0], [0], [0, 0, 1, 0], [], []>, precision = #tpu.contract_precision<fp32>} : vector<8x32xf32>, vector<8x32xf32>, vector<8x8xf32> -> vector<8x8xf32>
    %21 = arith.addf %19, %20 : vector<8x8xf32>
    %c0_24 = arith.constant 0 : index
    %c0_25 = arith.constant 0 : index
    %22 = vector.load %arg8[%c0_24, %c0_25] : memref<8x8xf32, #tpu.memory_space<vmem>>, vector<8x8xf32>
    tpu.vector_store %arg8[%c0_24, %c0_25], %21 {strides = array<i32>} : memref<8x8xf32, #tpu.memory_space<vmem>>, vector<8x8xf32>,
    %c0_26 = arith.constant 0 : index
    %c0_27 = arith.constant 0 : index
    %23 = vector.load %arg9[%c0_26, %c0_27] : memref<8x8xf32, #tpu.memory_space<vmem>>, vector<8x8xf32>
    %cst_28 = arith.constant dense<0.000000e+00> : vector<8x8xf32>
    %24 = tpu.matmul %3, %5, %cst_28 {dimension_numbers = #tpu.dot_dimension_numbers<[1], [1], [0], [0], [0, 0, 1, 0], [], []>, precision = #tpu.contract_precision<fp32>} : vector<8x32xf32>, vector<8x32xf32>, vector<8x8xf32> -> vector<8x8xf32>
    %25 = arith.addf %23, %24 : vector<8x8xf32>
    %c0_29 = arith.constant 0 : index
    %c0_30 = arith.constant 0 : index
    %26 = vector.load %arg9[%c0_29, %c0_30] : memref<8x8xf32, #tpu.memory_space<vmem>>, vector<8x8xf32>
    tpu.vector_store %arg9[%c0_29, %c0_30], %25 {strides = array<i32>} : memref<8x8xf32, #tpu.memory_space<vmem>>, vector<8x8xf32>,
    %c0_31 = arith.constant 0 : index
    %c0_32 = arith.constant 0 : index
    %27 = vector.load %arg10[%c0_31, %c0_32] : memref<8x8xf32, #tpu.memory_space<vmem>>, vector<8x8xf32>
    %cst_33 = arith.constant dense<0.000000e+00> : vector<8x8xf32>
    %28 = tpu.matmul %4, %5, %cst_33 {dimension_numbers = #tpu.dot_dimension_numbers<[1], [1], [0], [0], [0, 0, 1, 0], [], []>, precision = #tpu.contract_precision<fp32>} : vector<8x32xf32>, vector<8x32xf32>, vector<8x8xf32> -> vector<8x8xf32>
    %29 = arith.addf %27, %28 : vector<8x8xf32>
    %c0_34 = arith.constant 0 : index
    %c0_35 = arith.constant 0 : index
    %30 = vector.load %arg10[%c0_34, %c0_35] : memref<8x8xf32, #tpu.memory_space<vmem>>, vector<8x8xf32>
    tpu.vector_store %arg10[%c0_34, %c0_35], %29 {strides = array<i32>} : memref<8x8xf32, #tpu.memory_space<vmem>>, vector<8x8xf32>,
    %c0_36 = arith.constant 0 : index
    %c0_37 = arith.constant 0 : index
    %31 = vector.load %arg11[%c0_36, %c0_37] : memref<8x1xf32, #tpu.memory_space<vmem>>, vector<8x1xf32>
    %cst_38 = arith.constant dense<0.000000e+00> : vector<8x1xf32>
    %32 = tpu.matmul %3, %6, %cst_38 {dimension_numbers = #tpu.dot_dimension_numbers<[1], [1], [0], [0], [0, 0, 1, 0], [], []>, precision = #tpu.contract_precision<fp32>} : vector<8x32xf32>, vector<1x32xf32>, vector<8x1xf32> -> vector<8x1xf32>
    %33 = arith.addf %31, %32 : vector<8x1xf32>
    %c0_39 = arith.constant 0 : index
    %c0_40 = arith.constant 0 : index
    %34 = vector.load %arg11[%c0_39, %c0_40] : memref<8x1xf32, #tpu.memory_space<vmem>>, vector<8x1xf32>
    tpu.vector_store %arg11[%c0_39, %c0_40], %33 {strides = array<i32>} : memref<8x1xf32, #tpu.memory_space<vmem>>, vector<8x1xf32>,
    %c0_41 = arith.constant 0 : index
    %c0_42 = arith.constant 0 : index
    %35 = vector.load %arg12[%c0_41, %c0_42] : memref<8x1xf32, #tpu.memory_space<vmem>>, vector<8x1xf32>
    %cst_43 = arith.constant dense<0.000000e+00> : vector<8x1xf32>
    %36 = tpu.matmul %4, %6, %cst_43 {dimension_numbers = #tpu.dot_dimension_numbers<[1], [1], [0], [0], [0, 0, 1, 0], [], []>, precision = #tpu.contract_precision<fp32>} : vector<8x32xf32>, vector<1x32xf32>, vector<8x1xf32> -> vector<8x1xf32>
    %37 = arith.addf %35, %36 : vector<8x1xf32>
    %c0_44 = arith.constant 0 : index
    %c0_45 = arith.constant 0 : index
    %38 = vector.load %arg12[%c0_44, %c0_45] : memref<8x1xf32, #tpu.memory_space<vmem>>, vector<8x1xf32>
    tpu.vector_store %arg12[%c0_44, %c0_45], %37 {strides = array<i32>} : memref<8x1xf32, #tpu.memory_space<vmem>>, vector<8x1xf32>,
    %c0_46 = arith.constant 0 : index
    %c0_47 = arith.constant 0 : index
    %39 = vector.load %arg13[%c0_46, %c0_47] : memref<8x1xf32, #tpu.memory_space<vmem>>, vector<8x1xf32>
    %cst_48 = arith.constant dense<0.000000e+00> : vector<8x1xf32>
    %40 = tpu.matmul %5, %6, %cst_48 {dimension_numbers = #tpu.dot_dimension_numbers<[1], [1], [0], [0], [0, 0, 1, 0], [], []>, precision = #tpu.contract_precision<fp32>} : vector<8x32xf32>, vector<1x32xf32>, vector<8x1xf32> -> vector<8x1xf32>
    %41 = arith.addf %39, %40 : vector<8x1xf32>
    %c0_49 = arith.constant 0 : index
    %c0_50 = arith.constant 0 : index
    %42 = vector.load %arg13[%c0_49, %c0_50] : memref<8x1xf32, #tpu.memory_space<vmem>>, vector<8x1xf32>
    tpu.vector_store %arg13[%c0_49, %c0_50], %41 {strides = array<i32>} : memref<8x1xf32, #tpu.memory_space<vmem>>, vector<8x1xf32>,
    %c0_i32_51 = arith.constant 0 : i32
    %43 = arith.cmpi eq, %arg0, %c0_i32_51 : i32
    %44 = arith.extui %43 : i1 to i32
    %c0_i32_52 = arith.constant 0 : i32
    %45 = arith.cmpi ne, %44, %c0_i32_52 : i32
    scf.if %45 {
      %46 = tpu.iota {dimensions = array<i32: 0>} : vector<8x8xi32>
      %47 = tpu.iota {dimensions = array<i32: 1>} : vector<8x8xi32>
      %c0_53 = arith.constant 0 : index
      %c0_54 = arith.constant 0 : index
      %48 = vector.load %arg8[%c0_53, %c0_54] : memref<8x8xf32, #tpu.memory_space<vmem>>, vector<8x8xf32>
      %c0_55 = arith.constant 0 : index
      %c0_56 = arith.constant 0 : index
      %49 = vector.load %arg9[%c0_55, %c0_56] : memref<8x8xf32, #tpu.memory_space<vmem>>, vector<8x8xf32>
      %50 = arith.addf %48, %49 : vector<8x8xf32>
      %c0_57 = arith.constant 0 : index
      %c0_58 = arith.constant 0 : index
      %51 = vector.load %arg10[%c0_57, %c0_58] : memref<8x8xf32, #tpu.memory_space<vmem>>, vector<8x8xf32>
      %52 = arith.addf %50, %51 : vector<8x8xf32>
      %53 = arith.cmpi eq, %46, %47 : vector<8x8xi32>
      %cst_59 = arith.constant 0.000000e+00 : f32
      %54 = vector.broadcast %cst_59 : f32 to vector<8x8xf32>
      %55 = arith.select %53, %52, %54 : vector<8x8xi1>, vector<8x8xf32>
      %56 = vector.shape_cast %55 : vector<8x8xf32> to vector<1x8x8xf32>
      %cst_60 = arith.constant dense<0.000000e+00> : vector<1xf32>
      %57 = vector.multi_reduction <add>, %56, %cst_60 [1, 2] : vector<1x8x8xf32> to vector<1xf32>
      %58 = vector.shape_cast %57 : vector<1xf32> to vector<1x1x1xf32>
      %59 = vector.extract %58[0, 0, 0] : f32 from vector<1x1x1xf32>
      %c0_61 = arith.constant 0 : index
      %c0_62 = arith.constant 0 : index
      %60 = vector.load %arg11[%c0_61, %c0_62] : memref<8x1xf32, #tpu.memory_space<vmem>>, vector<8x1xf32>
      %cst_63 = arith.constant dense<0.000000e+00> : vector<8x8xf32>
      %61 = tpu.matmul %60, %60, %cst_63 {dimension_numbers = #tpu.dot_dimension_numbers<[1], [1], [0], [0], [0, 0, 1, 0], [], []>, precision = #tpu.contract_precision<fp32>} : vector<8x1xf32>, vector<8x1xf32>, vector<8x8xf32> -> vector<8x8xf32>
      %c0_64 = arith.constant 0 : index
      %c0_65 = arith.constant 0 : index
      %62 = vector.load %arg5[%c0_64, %c0_65] : memref<8x8xf32, #tpu.memory_space<vmem>>, vector<8x8xf32>
      %cst_66 = arith.constant 3.125000e-02 : f32
      %63 = vector.broadcast %cst_66 : f32 to vector<8x8xf32>
      %64 = arith.mulf %61, %63 : vector<8x8xf32>
      %65 = arith.subf %62, %64 : vector<8x8xf32>
      %c0_67 = arith.constant 0 : index
      %c0_68 = arith.constant 0 : index
      %66 = vector.load %arg12[%c0_67, %c0_68] : memref<8x1xf32, #tpu.memory_space<vmem>>, vector<8x1xf32>
      %cst_69 = arith.constant dense<0.000000e+00> : vector<8x8xf32>
      %67 = tpu.matmul %66, %66, %cst_69 {dimension_numbers = #tpu.dot_dimension_numbers<[1], [1], [0], [0], [0, 0, 1, 0], [], []>, precision = #tpu.contract_precision<fp32>} : vector<8x1xf32>, vector<8x1xf32>, vector<8x8xf32> -> vector<8x8xf32>
      %c0_70 = arith.constant 0 : index
      %c0_71 = arith.constant 0 : index
      %68 = vector.load %arg6[%c0_70, %c0_71] : memref<8x8xf32, #tpu.memory_space<vmem>>, vector<8x8xf32>
      %cst_72 = arith.constant 3.125000e-02 : f32
      %69 = vector.broadcast %cst_72 : f32 to vector<8x8xf32>
      %70 = arith.mulf %67, %69 : vector<8x8xf32>
      %71 = arith.subf %68, %70 : vector<8x8xf32>
      %c0_73 = arith.constant 0 : index
      %c0_74 = arith.constant 0 : index
      %72 = vector.load %arg13[%c0_73, %c0_74] : memref<8x1xf32, #tpu.memory_space<vmem>>, vector<8x1xf32>
      %cst_75 = arith.constant dense<0.000000e+00> : vector<8x8xf32>
      %73 = tpu.matmul %72, %72, %cst_75 {dimension_numbers = #tpu.dot_dimension_numbers<[1], [1], [0], [0], [0, 0, 1, 0], [], []>, precision = #tpu.contract_precision<fp32>} : vector<8x1xf32>, vector<8x1xf32>, vector<8x8xf32> -> vector<8x8xf32>
      %c0_76 = arith.constant 0 : index
      %c0_77 = arith.constant 0 : index
      %74 = vector.load %arg7[%c0_76, %c0_77] : memref<8x8xf32, #tpu.memory_space<vmem>>, vector<8x8xf32>
      %cst_78 = arith.constant 3.125000e-02 : f32
      %75 = vector.broadcast %cst_78 : f32 to vector<8x8xf32>
      %76 = arith.mulf %73, %75 : vector<8x8xf32>
      %77 = arith.subf %74, %76 : vector<8x8xf32>
      %78 = arith.mulf %65, %71 : vector<8x8xf32>
      %79 = arith.mulf %65, %77 : vector<8x8xf32>
      %80 = arith.addf %78, %79 : vector<8x8xf32>
      %81 = arith.mulf %71, %77 : vector<8x8xf32>
      %82 = arith.addf %80, %81 : vector<8x8xf32>
      %83 = vector.shape_cast %82 : vector<8x8xf32> to vector<1x8x8xf32>
      %cst_79 = arith.constant dense<0.000000e+00> : vector<1xf32>
      %84 = vector.multi_reduction <add>, %83, %cst_79 [1, 2] : vector<1x8x8xf32> to vector<1xf32>
      %85 = vector.shape_cast %84 : vector<1xf32> to vector<1x1x1xf32>
      %86 = vector.extract %85[0, 0, 0] : f32 from vector<1x1x1xf32>
      %cst_80 = arith.constant 5.000000e-01 : f32
      %87 = arith.mulf %cst_80, %86 : f32
      %cst_81 = arith.constant 0.0322580636 : f32
      %88 = arith.mulf %87, %cst_81 : f32
      %cst_82 = arith.constant 0.0322580636 : f32
      %89 = arith.mulf %88, %cst_82 : f32
      %90 = arith.subf %59, %89 : f32
      %cst_83 = arith.constant 1.250000e-01 : f32
      %91 = arith.mulf %90, %cst_83 : f32
      %cst_84 = arith.constant 0.000000e+00 : f32
      %92 = arith.subf %cst_84, %91 : f32
      %cst_85 = arith.constant 1.250000e-01 : f32
      %93 = arith.mulf %92, %cst_85 : f32
      %c0_86 = arith.constant 0 : index
      %94 = memref.load %arg4[%c0_86] : memref<1xf32, #tpu.memory_space<smem>>
      memref.store %93, %arg4[%c0_86] : memref<1xf32, #tpu.memory_space<smem>>
    } else {
    }
    return
  }
  func.func @transform_0(%arg0: i32) -> (i32, i32) {
    %c0_i32 = arith.constant 0 : i32
    %c0_i32_0 = arith.constant 0 : i32
    return %c0_i32, %arg0 : i32, i32
  }
  func.func @transform_1(%arg0: i32) -> (i32, i32) {
    %c0_i32 = arith.constant 0 : i32
    %c0_i32_0 = arith.constant 0 : i32
    return %c0_i32, %arg0 : i32, i32
  }
  func.func @transform_2(%arg0: i32) -> (i32, i32) {
    %c0_i32 = arith.constant 0 : i32
    %c0_i32_0 = arith.constant 0 : i32
    return %c0_i32, %arg0 : i32, i32
  }
  func.func @transform_3(%arg0: i32) -> i32 {
    %c0_i32 = arith.constant 0 : i32
    %c0_i32_0 = arith.constant 0 : i32
    return %c0_i32 : i32
  }
}

</mosaic_0001>

<bundles_post_ra>
// kernel: tpu_custom_call.1
= control target key start
LH: loop header
LB: loop body
LE: loop exit
PB: predicated region body
PF: predicated region fallthrough
CT: control target
= control target key end

     0   :  { %8 = vsyncpa [#allocation12], 0  ;;  %s5099_s0 = inlined_call_operand.hbm [shape: f32[8,32], index: 0, kind: input, shape index: {}]   ;;  %s5100_s1 = inlined_call_operand.hbm [shape: f32[8,32], index: 1, kind: input, shape index: {}]   ;;  %s5101_s2 = inlined_call_operand.hbm [shape: f32[8,32], index: 2, kind: input, shape index: {}]   ;;  %s5102_s3 = inlined_call_operand.hbm [shape: f32[1], index: 3, kind: output, shape index: {}]  }
   0x1   :  { %9 = vsyncpa [#allocation15], 0 }
   0x2   :  { %10 = vsyncpa [#allocation13], 0  ;;  %s4714_s12 = smov [#allocation14]   ;;  %s4715_s14 = smov [#allocation11]  }
   0x3   :  { %s27_s13 = sshll.u32 %s4714_s12, 4  ;;  %s17_s15 = sshll.u32 %s4715_s14, 4  ;;  %s28_s13 = int_to_ptr.vmem [resolvable:$true] %s27_s13  ;;  %s18_s15 = int_to_ptr.vmem [resolvable:$true] %s17_s15 }
   0x4   :  { %s4632_s18 = scalar_lea.hbm %s5100_s1, 128 }
   0x5   :  { %p4633_p0 = scmp.ne.s32.totalorder %s5100_s1, %s4632_s18  ;;  %p4636_p1 = scmp.lt.u32.totalorder %s4632_s18, %s5100_s1 }
   0x7   :  { %p4638_p2 = pnand %p4636_p1, %p4633_p0 }
   0x9   :  { %4641 = shalt.err (!%p4638_p2)
}
   0xa   :  { %s4642_s23 = scalar_lea.vmem %s28_s13, 128  ;;  %p4647_p4 = scmp.lt.s32.totalorder %s28_s13, %s28_s13 }
   0xb   :  { %p4643_p3 = scmp.ne.s32.totalorder %s28_s13, %s4642_s23  ;;  %p4648_p5 = scmp.lt.s32.totalorder %s4642_s23, %s4642_s23 }
   0xd   :  { %p4649_p6 = por %p4648_p5, %p4647_p4 }
   0xf   :  { %p4650_p7 = pnand %p4649_p6, %p4643_p3 }
  0x11   :  { %4653 = shalt.err (!%p4650_p7)
}
  0x12   :  { %30 = dma.hbm_to_vmem [thread:$0]  %s5100_s1, 128, %s28_s13, [#allocation15]  }
  0x13   :  { %s4654_s28 = scalar_lea.hbm %s5099_s0, 128 }
  0x14   :  { %p4655_p8 = scmp.ne.s32.totalorder %s5099_s0, %s4654_s28  ;;  %p4658_p9 = scmp.lt.u32.totalorder %s4654_s28, %s5099_s0 }
  0x16   :  { %p4660_p10 = pnand %p4658_p9, %p4655_p8 }
  0x18   :  { %4663 = shalt.err (!%p4660_p10)
}
  0x19   :  { %s4664_s6 = scalar_lea.vmem %s18_s15, 128  ;;  %p4669_p12 = scmp.lt.s32.totalorder %s18_s15, %s18_s15 }
  0x1a   :  { %p4665_p11 = scmp.ne.s32.totalorder %s18_s15, %s4664_s6  ;;  %p4670_p13 = scmp.lt.s32.totalorder %s4664_s6, %s4664_s6 }
  0x1c   :  { %p4671_p0 = por %p4670_p13, %p4669_p12 }
  0x1e   :  { %p4672_p1 = pnand %p4671_p0, %p4665_p11 }
  0x20   :  { %4675 = shalt.err (!%p4672_p1)
}
  0x21   :  { %20 = dma.hbm_to_vmem [thread:$0]  %s5099_s0, 128, %s18_s15, [#allocation12]  }
  0x22   :  { %s4716_s8 = smov [#allocation16]   ;;  %s4676_s12 = scalar_lea.hbm %s5101_s2, 128 }
  0x23   :  { %s37_s9 = sshll.u32 %s4716_s8, 4  ;;  %p4677_p2 = scmp.ne.s32.totalorder %s5101_s2, %s4676_s12  ;;  %s38_s9 = int_to_ptr.vmem [resolvable:$true] %s37_s9 }
  0x24   :  { %p4680_p3 = scmp.lt.u32.totalorder %s4676_s12, %s5101_s2 }
  0x26   :  { %p4682_p4 = pnand %p4680_p3, %p4677_p2 }
  0x28   :  { %4685 = shalt.err (!%p4682_p4)
}
  0x29   :  { %s4686_s18 = scalar_lea.vmem %s38_s9, 128  ;;  %p4691_p6 = scmp.lt.s32.totalorder %s38_s9, %s38_s9 }
  0x2a   :  { %p4687_p5 = scmp.ne.s32.totalorder %s38_s9, %s4686_s18  ;;  %p4692_p7 = scmp.lt.s32.totalorder %s4686_s18, %s4686_s18 }
  0x2c   :  { %p4693_p8 = por %p4692_p7, %p4691_p6 }
  0x2e   :  { %p4694_p9 = pnand %p4693_p8, %p4687_p5 }
  0x30   :  { %4697 = shalt.err (!%p4694_p9)
}
  0x31   :  { %40 = dma.hbm_to_vmem [thread:$0]  %s5101_s2, 128, %s38_s9, [#allocation15]  }
  0x32   :  { %4708 = dma.done.wait [#allocation12], 128  }
  0x33   :  { %4709 = vsyncadd [#allocation12], 4294967168 }
  0x34   :  { %4710 = dma.done.wait [#allocation15], 256  }
  0x35   :  { %4711 = vsyncadd [#allocation15], 4294967040  ;;  %vm61_vm0 = vcmask 7168   ;;  %v4717_v0 = vmov 0.0   ;;  %vm4718_vm1 = vmmov 0   ;;  %vm69_vm2 = vcmask 261120  }
  0x36   :  { %4322 = vmatprep.subr.mxu1 %v4717_v0  ;;  %4324 = vmatprep.mubr.msk.f32.mxu1 %vm4718_vm1, %v4717_v0  ;;  %62 = vst.msk [vmem:[#allocation8] sm:$0xff] %vm61_vm0, %v4717_v0  ;;  %63 = vst.msk [vmem:[#allocation9] sm:$0xff] %vm61_vm0, %v4717_v0  ;;  %v65_v1 = vld [vmem:[#allocation11] sm:$0xff]  ;;  %v66_v2 = vld [vmem:[#allocation14] sm:$0xff]  ;;  %vm54_vm3 = vcmask 64512   ;;  %s4698_s29 = scalar_lea.hbm %s5102_s3, 16 }
  0x37   :  { %64 = vst.msk [vmem:[#allocation10] sm:$0xff] %vm61_vm0, %v4717_v0  ;;  %4352 = vmatprep.subr.mxu0 %v4717_v0  ;;  %4354 = vmatprep.mubr.msk.f32.mxu0 %vm4718_vm1, %v4717_v0  ;;  %v67_v3 = vld [vmem:[#allocation16] sm:$0xff]  ;;  %v2774_v4 = vsel %vm69_vm2, %v65_v1, 0.0  ;;  %v71_v5 = vsel %vm69_vm2, %v65_v1, 0  ;;  %v524_v6 = vsel %vm69_vm2, %v66_v2, 0  ;;  %v2781_v10 = vsel %vm69_vm2, %v66_v2, 0.0  ;;  %p4699_p10 = scmp.ne.s32.totalorder %s5102_s3, %s4698_s29  ;;  %p4702_p11 = scmp.lt.u32.totalorder %s4698_s29, %s5102_s3 }
  0x38   :  { %2775 = vadd.xlane.f32.xlu0 %v2774_v4  ;;  %v4788_v7 = vand.u32 4294901760, %v71_v5  ;;  %v4790_v8 = vand.u32 4294901760, %v524_v6  ;;  %v2787_v9 = vsel %vm69_vm2, %v67_v3, 0.0  ;;  %v976_v11 = vsel %vm69_vm2, %v67_v3, 0  ;;  %55 = vst.msk [vmem:[#allocation2] sm:$0xff] %vm54_vm3, %v4717_v0  ;;  %56 = vst.msk [vmem:[#allocation3] sm:$0xff] %vm54_vm3, %v4717_v0 }
  0x39   :  { %2788 = vadd.xlane.f32.xlu1 %v2787_v9  ;;  %v4802_v14 = vand.u32 4294901760, %v976_v11  ;;  %57 = vst.msk [vmem:[#allocation4] sm:$0xff] %vm54_vm3, %v4717_v0  ;;  %58 = vst.msk [vmem:[#allocation5] sm:$0xff] %vm54_vm3, %v4717_v0  ;;  %p4704_p12 = pnand %p4702_p11, %p4699_p10 }
  0x3a   :  { %v4793_v12 = vsub.f32 %v71_v5, %v4788_v7  ;;  %v4796_v13 = vsub.f32 %v524_v6, %v4790_v8  ;;  %4323 = vmatpush3.xpose.msra.mxu1 %v4788_v7  ;;  %4353 = vmatpush3.xpose.msra.mxu0 %v4790_v8  ;;  %59 = vst.msk [vmem:[#allocation6] sm:$0xff] %vm54_vm3, %v4717_v0  ;;  %60 = vst.msk [vmem:[#allocation7] sm:$0xff] %vm54_vm3, %v4717_v0 }
  0x3b   :  { %4327 = vmatprep.subr.mxu1 %v4717_v0  ;;  %4362 = vmatprep.subr.mxu0 %v4717_v0  ;;  %v4815_v19 = vsub.f32 %v976_v11, %v4802_v14 }
  0x3c   :  { %2782 = vadd.xlane.f32.xlu0 %v2781_v10  ;;  %v4805_v15 = vand.u32 4294901760, %v4793_v12  ;;  %v4808_v16 = vand.u32 4294901760, %v4796_v13 }
  0x3d   :  { %v4829_v22 = vand.u32 4294901760, %v4815_v19  ;;  %v2773_v25 = vld [vmem:[#allocation8] sm:$0xff]  ;;  %v2780_v30 = vld [vmem:[#allocation9] sm:$0xff] }
  0x3e   :  { %v142_v17 = vsub.f32 %v4793_v12, %v4805_v15  ;;  %v595_v18 = vsub.f32 %v4796_v13, %v4808_v16  ;;  %v2786_v26 = vld [vmem:[#allocation10] sm:$0xff] }
  0x3f   :  { %v1047_v23 = vsub.f32 %v4815_v19, %v4829_v22 }
  0x40   :  { %v4817_v20 = vand.u32 4294901760, %v142_v17  ;;  %v4819_v21 = vand.u32 4294901760, %v595_v18 }
  0x41   :  { %v4852_v24 = vand.u32 4294901760, %v1047_v23 }
  0x42   :  { %4325 = vmatmul.mubr.f32.vlgmr.msra.gmra.mrb[0].mxu1 %v4817_v20  ;;  %4355 = vmatmul.mubr.f32.vlgmr.msra.gmra.mrb[0].mxu0 %v4819_v21 }
  0x43   :  { %4328 = vmatpush3.xpose.msra.mxu1 %v4817_v20  ;;  %4329 = vmatprep.mubr.msk.f32.mxu1 %vm4718_vm1, %v4717_v0 }
  0x44   :  { %4332 = vmatprep.subr.mxu1 %v4717_v0  ;;  %4363 = vmatpush3.xpose.msra.mxu0 %v4796_v13 }
  0x45   :  { %4364 = vmatprep.mubr.msk.f32.mxu0 %vm4718_vm1, %v4717_v0  ;;  %4372 = vmatprep.subr.mxu0 %v4717_v0 }
  0x46   :  { %4330 = vmatmul.mubr.f32.vlgmr.msra.gmra.mrb[2].mxu1 %v4788_v7 }
  0x47   :  { %4333 = vmatpush3.xpose.msra.mxu1 %v4793_v12  ;;  %4334 = vmatprep.mubr.msk.f32.mxu1 %vm4718_vm1, %v4717_v0 }
  0x48   :  { %4337 = vmatprep.subr.mxu1 %v4717_v0  ;;  %4365 = vmatmul.mubr.f32.vlgmr.msra.gmra.mrb[2].mxu0 %v4796_v13 }
  0x49   :  { %4373 = vmatpush3.xpose.msra.mxu0 %v4808_v16  ;;  %4374 = vmatprep.mubr.msk.f32.mxu0 %vm4718_vm1, %v4717_v0 }
  0x4a   :  { %4335 = vmatmul.mubr.f32.vlgmr.msra.gmra.mrb[4].mxu1 %v4793_v12  ;;  %4382 = vmatprep.subr.mxu0 %v4717_v0 }
  0x4b   :  { %4338 = vmatpush3.xpose.msra.mxu1 %v4788_v7  ;;  %4339 = vmatprep.mubr.msk.f32.mxu1 %vm4718_vm1, %v4717_v0 }
  0x4c   :  { %4342 = vmatprep.subr.mxu1 %v4717_v0  ;;  %4375 = vmatmul.mubr.f32.vlgmr.msra.gmra.mrb[4].mxu0 %v4790_v8 }
  0x4d   :  { %4383 = vmatpush3.xpose.msra.mxu0 %v4802_v14  ;;  %4384 = vmatprep.mubr.msk.f32.mxu0 %vm4718_vm1, %v4717_v0 }
  0x4e   :  { %4340 = vmatmul.mubr.f32.vlgmr.msra.gmra.mrb[6].mxu1 %v4805_v15  ;;  %4392 = vmatprep.subr.mxu0 %v4717_v0 }
  0x4f   :  { %4343 = vmatpush3.xpose.msra.mxu1 %v4805_v15  ;;  %4344 = vmatprep.mubr.msk.f32.mxu1 %vm4718_vm1, %v4717_v0 }
  0x50   :  { %4347 = vmatprep.subr.mxu1 %v4717_v0  ;;  %4385 = vmatmul.mubr.f32.vlgmr.msra.gmra.mrb[6].mxu0 %v4852_v24 }
  0x51   :  { %4393 = vmatpush3.xpose.msra.mxu0 %v4815_v19  ;;  %4394 = vmatprep.mubr.msk.f32.mxu0 %vm4718_vm1, %v4717_v0 }
  0x52   :  { %4345 = vmatmul.mubr.f32.vlgmr.msra.gmra.mrb[8].mxu1 %v4788_v7  ;;  %4402 = vmatprep.subr.mxu0 %v4717_v0 }
  0x53   :  { %4348 = vmatpush3.xpose.msra.mxu1 %v4788_v7  ;;  %4349 = vmatprep.mubr.msk.f32.mxu1 %vm4718_vm1, %v4717_v0 }
  0x54   :  { %4357 = vmatprep.subr.mxu1 %v4717_v0  ;;  %4395 = vmatmul.mubr.f32.vlgmr.msra.gmra.mrb[8].mxu0 %v4815_v19 }
  0x55   :  { %4403 = vmatpush3.xpose.msra.mxu0 %v4829_v22  ;;  %4404 = vmatprep.mubr.msk.f32.mxu0 %vm4718_vm1, %v4717_v0 }
  0x56   :  { %4350 = vmatmul.mubr.f32.vlgmr.msra.gmra.mrb[10].mxu1 %v4788_v7  ;;  %4412 = vmatprep.subr.mxu0 %v4717_v0 }
  0x57   :  { %4358 = vmatpush3.xpose.msra.mxu1 %v4819_v21  ;;  %4359 = vmatprep.mubr.msk.f32.mxu1 %vm4718_vm1, %v4717_v0 }
  0x58   :  { %4367 = vmatprep.subr.mxu1 %v4717_v0  ;;  %4405 = vmatmul.mubr.f32.vlgmr.msra.gmra.mrb[10].mxu0 %v4802_v14 }
  0x59   :  { %4413 = vmatpush3.xpose.msra.mxu0 %v4790_v8  ;;  %4414 = vmatprep.mubr.msk.f32.mxu0 %vm4718_vm1, %v4717_v0 }
  0x5a   :  { %4360 = vmatmul.mubr.f32.vlgmr.msra.gmra.mrb[12].mxu1 %v4790_v8  ;;  %4422 = vmatprep.subr.mxu0 %v4717_v0 }
  0x5b   :  { %4368 = vmatpush3.xpose.msra.mxu1 %v4790_v8  ;;  %4369 = vmatprep.mubr.msk.f32.mxu1 %vm4718_vm1, %v4717_v0 }
  0x5c   :  { %4377 = vmatprep.subr.mxu1 %v4717_v0  ;;  %4415 = vmatmul.mubr.f32.vlgmr.msra.gmra.mrb[12].mxu0 %v4817_v20 }
  0x5d   :  { %4423 = vmatpush3.xpose.msra.mxu0 %v4796_v13  ;;  %4424 = vmatprep.mubr.msk.f32.mxu0 %vm4718_vm1, %v4717_v0 }
  0x5e   :  { %4370 = vmatmul.mubr.f32.vlgmr.msra.gmra.mrb[14].mxu1 %v4808_v16  ;;  %4432 = vmatprep.subr.mxu0 %v4717_v0 }
  0x5f   :  { %4378 = vmatpush3.xpose.msra.mxu1 %v4790_v8  ;;  %4379 = vmatprep.mubr.msk.f32.mxu1 %vm4718_vm1, %v4717_v0 }
  0x60   :  { %4387 = vmatprep.subr.mxu1 %v4717_v0  ;;  %4425 = vmatmul.mubr.f32.vlgmr.msra.gmra.mrb[14].mxu0 %v4793_v12 }
  0x61   :  { %4433 = vmatpush3.xpose.msra.mxu0 %v4808_v16  ;;  %4434 = vmatprep.mubr.msk.f32.mxu0 %vm4718_vm1, %v4717_v0 }
  0x62   :  { %4380 = vmatmul.mubr.f32.vlgmr.msra.gmra.mrb[16].mxu1 %v4790_v8  ;;  %4442 = vmatprep.subr.mxu0 %v4717_v0 }
  0x63   :  { %4388 = vmatpush3.xpose.msra.mxu1 %v4852_v24  ;;  %4389 = vmatprep.mubr.msk.f32.mxu1 %vm4718_vm1, %v4717_v0 }
  0x64   :  { %4397 = vmatprep.subr.mxu1 %v4717_v0  ;;  %4435 = vmatmul.mubr.f32.vlgmr.msra.gmra.mrb[16].mxu0 %v4788_v7 }
  0x65   :  { %4443 = vmatpush3.xpose.msra.mxu0 %v4802_v14  ;;  %4444 = vmatprep.mubr.msk.f32.mxu0 %vm4718_vm1, %v4717_v0 }
  0x66   :  { %4390 = vmatmul.mubr.f32.vlgmr.msra.gmra.mrb[18].mxu1 %v4802_v14  ;;  %4452 = vmatprep.subr.mxu0 %v4717_v0 }
  0x67   :  { %4398 = vmatpush3.xpose.msra.mxu1 %v4802_v14  ;;  %4399 = vmatprep.mubr.msk.f32.mxu1 %vm4718_vm1, %v4717_v0 }
  0x68   :  { %4407 = vmatprep.subr.mxu1 %v4717_v0  ;;  %4445 = vmatmul.mubr.f32.vlgmr.msra.gmra.mrb[18].mxu0 %v4817_v20 }
  0x69   :  { %4453 = vmatpush3.xpose.msra.mxu0 %v4815_v19  ;;  %4454 = vmatprep.mubr.msk.f32.mxu0 %vm4718_vm1, %v4717_v0 }
  0x6a   :  { %4400 = vmatmul.mubr.f32.vlgmr.msra.gmra.mrb[20].mxu1 %v4829_v22  ;;  %4462 = vmatprep.subr.mxu0 %v4717_v0 }
  0x6b   :  { %4408 = vmatpush3.xpose.msra.mxu1 %v4802_v14  ;;  %4409 = vmatprep.mubr.msk.f32.mxu1 %vm4718_vm1, %v4717_v0 }
  0x6c   :  { %4417 = vmatprep.subr.mxu1 %v4717_v0  ;;  %4455 = vmatmul.mubr.f32.vlgmr.msra.gmra.mrb[20].mxu0 %v4793_v12 }
  0x6d   :  { %4463 = vmatpush3.xpose.msra.mxu0 %v4829_v22  ;;  %4464 = vmatprep.mubr.msk.f32.mxu0 %vm4718_vm1, %v4717_v0 }
  0x6e   :  { %4410 = vmatmul.mubr.f32.vlgmr.msra.gmra.mrb[22].mxu1 %v4802_v14  ;;  %4472 = vmatprep.subr.mxu0 %v4717_v0 }
  0x6f   :  { %4418 = vmatpush3.xpose.msra.mxu1 %v4819_v21  ;;  %4419 = vmatprep.mubr.msk.f32.mxu1 %vm4718_vm1, %v4717_v0 }
  0x70   :  { %4427 = vmatprep.subr.mxu1 %v4717_v0  ;;  %4465 = vmatmul.mubr.f32.vlgmr.msra.gmra.mrb[22].mxu0 %v4788_v7 }
  0x71   :  { %4473 = vmatpush3.xpose.msra.mxu0 %v4802_v14  ;;  %4474 = vmatprep.mubr.msk.f32.mxu0 %vm4718_vm1, %v4717_v0 }
  0x72   :  { %4420 = vmatmul.mubr.f32.vlgmr.msra.gmra.mrb[24].mxu1 %v4788_v7  ;;  %4482 = vmatprep.subr.mxu0 %v4717_v0 }
  0x73   :  { %4428 = vmatpush3.xpose.msra.mxu1 %v4790_v8  ;;  %4429 = vmatprep.mubr.msk.f32.mxu1 %vm4718_vm1, %v4717_v0 }
  0x74   :  { %4437 = vmatprep.subr.mxu1 %v4717_v0  ;;  %4475 = vmatmul.mubr.f32.vlgmr.msra.gmra.mrb[24].mxu0 %v4819_v21 }
  0x75   :  { %4483 = vmatpush3.xpose.msra.mxu0 %v4815_v19  ;;  %4484 = vmatprep.mubr.msk.f32.mxu0 %vm4718_vm1, %v4717_v0 }
  0x76   :  { %4430 = vmatmul.mubr.f32.vlgmr.msra.gmra.mrb[26].mxu1 %v4805_v15  ;;  %4492 = vmatprep.subr.mxu0 %v4717_v0 }
  0x77   :  { %4438 = vmatpush3.xpose.msra.mxu1 %v4790_v8  ;;  %4439 = vmatprep.mubr.msk.f32.mxu1 %vm4718_vm1, %v4717_v0 }
  0x78   :  { %4447 = vmatprep.subr.mxu1 %v4717_v0  ;;  %4485 = vmatmul.mubr.f32.vlgmr.msra.gmra.mrb[26].mxu0 %v4796_v13 }
  0x79   :  { %4493 = vmatpush3.xpose.msra.mxu0 %v4829_v22  ;;  %4494 = vmatprep.mubr.msk.f32.mxu0 %vm4718_vm1, %v4717_v0 }
  0x7a   :  { %4440 = vmatmul.mubr.f32.vlgmr.msra.gmra.mrb[28].mxu1 %v4788_v7  ;;  %4502 = vmatprep.subr.mxu0 %v4717_v0 }
  0x7b   :  { %4448 = vmatpush3.xpose.msra.mxu1 %v4852_v24  ;;  %4449 = vmatprep.mubr.msk.f32.mxu1 %vm4718_vm1, %v4717_v0 }
  0x7c   :  { %4457 = vmatprep.subr.mxu1 %v4717_v0  ;;  %4495 = vmatmul.mubr.f32.vlgmr.msra.gmra.mrb[28].mxu0 %v4790_v8 }
  0x7d   :  { %4504 = vmatprep.mubr.msk.f32.mxu0 %vm4718_vm1, %v4717_v0 }
  0x7e   :  { %4450 = vmatmul.mubr.f32.vlgmr.msra.gmra.mrb[30].mxu1 %v4788_v7 }
  0x7f   :  { %4458 = vmatpush3.xpose.msra.mxu1 %v4802_v14  ;;  %4459 = vmatprep.mubr.msk.f32.mxu1 %vm4718_vm1, %v4717_v0 }
  0x80   :  { %4467 = vmatprep.subr.mxu1 %v4717_v0 }
  0x82   :  { %4460 = vmatmul.mubr.f32.vlgmr.msra.gmra.mrb[32].mxu1 %v4805_v15 }
  0x83   :  { %4468 = vmatpush3.xpose.msra.mxu1 %v4802_v14  ;;  %4469 = vmatprep.mubr.msk.f32.mxu1 %vm4718_vm1, %v4717_v0 }
  0x84   :  { %4477 = vmatprep.subr.mxu1 %v4717_v0 }
  0x86   :  { %4470 = vmatmul.mubr.f32.vlgmr.msra.gmra.mrb[34].mxu1 %v4788_v7 }
  0x87   :  { %4478 = vmatpush3.xpose.msra.mxu1 %v4852_v24  ;;  %4479 = vmatprep.mubr.msk.f32.mxu1 %vm4718_vm1, %v4717_v0 }
  0x88   :  { %4487 = vmatprep.subr.mxu1 %v4717_v0 }
  0x8a   :  { %4480 = vmatmul.mubr.f32.vlgmr.msra.gmra.mrb[36].mxu1 %v4790_v8 }
  0x8b   :  { %4488 = vmatpush3.xpose.msra.mxu1 %v4802_v14  ;;  %4489 = vmatprep.mubr.msk.f32.mxu1 %vm4718_vm1, %v4717_v0 }
  0x8c   :  { %4497 = vmatprep.subr.mxu1 %v4717_v0 }
  0x8e   :  { %4490 = vmatmul.mubr.f32.vlgmr.msra.gmra.mrb[38].mxu1 %v4808_v16  ;;  %v68_v16 = vld [vmem:[#allocation2] sm:$0xff] }
  0x8f   :  { %4498 = vmatpush3.xpose.msra.mxu1 %v4802_v14  ;;  %4499 = vmatprep.mubr.msk.f32.mxu1 %vm4718_vm1, %v4717_v0 }
  0x90   :  { %4532 = vmatprep.subr.mxu1 %v4717_v0 }
  0x92   :  { %4500 = vmatmul.mubr.f32.vlgmr.msra.gmra.mrb[40].mxu1 %v4790_v8 }
  0x93   :  { %4534 = vmatprep.mubr.msk.f32.mxu1 %vm4718_vm1, %v4717_v0 }
  0xc5   :  { %v2776_v27 = vpop.xlane.xlu0 %2775 }
  0xc6   :  { %v2777_v28 = vadd.f32 %v2776_v27, %v2773_v25  ;;  %v2789_v29 = vpop.xlane.xlu1 %2788 }
  0xc7   :  { %v2790_v31 = vadd.f32 %v2789_v29, %v2786_v26 }
  0xc8   :  { %2779 = vst.msk [vmem:[#allocation8] sm:$0xff] %vm61_vm0, %v2777_v28 }
  0xc9   :  { %v2783_v32 = vpop.xlane.xlu0 %2782  ;;  %2791 = vst.msk [vmem:[#allocation10] sm:$0xff] %vm61_vm0, %v2790_v31 }
  0xca   :  { %v2784_v33 = vadd.f32 %v2783_v32, %v2780_v30 }
  0xcc   :  { %2785 = vst.msk [vmem:[#allocation9] sm:$0xff] %vm61_vm0, %v2784_v33 }
  0xcf   :  { %v2816_v34 = vld [vmem:[#allocation8] sm:$0xff] }
  0xd0   :  { %v2818_v35 = vsel %vm61_vm0, %v2816_v34, 0  ;;  %v3722_v48 = vld [vmem:[#allocation10] sm:$0xff]  ;;  %v522_v34 = vld [vmem:[#allocation3] sm:$0xff] }
  0xd1   :  { %v2821_v36 = vand.u32 4294901760, %v2818_v35  ;;  %v3724_v49 = vsel %vm61_vm0, %v3722_v48, 0 }
  0xd2   :  { %v5045_v50 = vand.u32 4294901760, %v3724_v49 }
  0xd3   :  { %4503 = vmatpush3.xpose.msra.mxu0 %v2821_v36  ;;  %v2887_v37 = vsub.f32 %v2818_v35, %v2821_v36  ;;  %v3269_v38 = vld [vmem:[#allocation9] sm:$0xff] }
  0xd4   :  { %4507 = vmatprep.subr.mxu0 %v4717_v0  ;;  %v3271_v39 = vsel %vm61_vm0, %v3269_v38, 0  ;;  %v3793_v51 = vsub.f32 %v3724_v49, %v5045_v50 }
  0xd5   :  { %v2888_v40 = vand.u32 4294901760, %v2887_v37  ;;  %v3274_v41 = vand.u32 4294901760, %v3271_v39 }
  0xd6   :  { %v3794_v52 = vand.u32 4294901760, %v3793_v51 }
  0xd7   :  { %v2889_v42 = vsub.f32 %v2887_v37, %v2888_v40  ;;  %4533 = vmatpush3.xpose.msra.mxu1 %v3274_v41  ;;  %v3340_v43 = vsub.f32 %v3271_v39, %v3274_v41 }
  0xd8   :  { %4537 = vmatprep.subr.mxu1 %v4717_v0  ;;  %v3795_v53 = vsub.f32 %v3793_v51, %v3794_v52 }
  0xd9   :  { %v2890_v44 = vand.u32 4294901760, %v2889_v42  ;;  %v3341_v45 = vand.u32 4294901760, %v3340_v43 }
  0xda   :  { %v3796_v54 = vand.u32 4294901760, %v3795_v53  ;;  %v974_v53 = vld [vmem:[#allocation4] sm:$0xff] }
  0xdb   :  { %4505 = vmatmul.mubr.f32.vlgmr.msra.gmra.mrb[30].mxu0 %v2890_v44  ;;  %v3342_v46 = vsub.f32 %v3340_v43, %v3341_v45 }
  0xdc   :  { %4508 = vmatpush3.xpose.msra.mxu0 %v2890_v44  ;;  %4509 = vmatprep.mubr.msk.f32.mxu0 %vm4718_vm1, %v4717_v0 }
  0xdd   :  { %v3343_v47 = vand.u32 4294901760, %v3342_v46  ;;  %4512 = vmatprep.subr.mxu0 %v4717_v0 }
  0xdf   :  { %4535 = vmatmul.mubr.f32.vlgmr.msra.gmra.mrb[42].mxu1 %v3343_v47 }
  0xe0   :  { %4538 = vmatpush3.xpose.msra.mxu1 %v3343_v47  ;;  %4539 = vmatprep.mubr.msk.f32.mxu1 %vm4718_vm1, %v4717_v0 }
  0xe1   :  { %4542 = vmatprep.subr.mxu1 %v4717_v0 }
  0xe3   :  { %4510 = vmatmul.mubr.f32.vlgmr.msra.gmra.mrb[30].mxu0 %v2821_v36 }
  0xe4   :  { %4513 = vmatpush3.xpose.msra.mxu0 %v2887_v37  ;;  %4514 = vmatprep.mubr.msk.f32.mxu0 %vm4718_vm1, %v4717_v0 }
  0xe5   :  { %4517 = vmatprep.subr.mxu0 %v4717_v0 }
  0xe7   :  { %4540 = vmatmul.mubr.f32.vlgmr.msra.gmra.mrb[42].mxu1 %v3274_v41 }
  0xe8   :  { %4543 = vmatpush3.xpose.msra.mxu1 %v3340_v43  ;;  %4544 = vmatprep.mubr.msk.f32.mxu1 %vm4718_vm1, %v4717_v0 }
  0xe9   :  { %4547 = vmatprep.subr.mxu1 %v4717_v0 }
  0xeb   :  { %4515 = vmatmul.mubr.f32.vlgmr.msra.gmra.mrb[30].mxu0 %v2887_v37 }
  0xec   :  { %4518 = vmatpush3.xpose.msra.mxu0 %v2821_v36  ;;  %4519 = vmatprep.mubr.msk.f32.mxu0 %vm4718_vm1, %v4717_v0 }
  0xed   :  { %4522 = vmatprep.subr.mxu0 %v4717_v0 }
  0xef   :  { %4545 = vmatmul.mubr.f32.vlgmr.msra.gmra.mrb[42].mxu1 %v3340_v43 }
  0xf0   :  { %4548 = vmatpush3.xpose.msra.mxu1 %v3274_v41  ;;  %4549 = vmatprep.mubr.msk.f32.mxu1 %vm4718_vm1, %v4717_v0 }
  0xf1   :  { %4552 = vmatprep.subr.mxu1 %v4717_v0 }
  0xf3   :  { %4520 = vmatmul.mubr.f32.vlgmr.msra.gmra.mrb[30].mxu0 %v2888_v40 }
  0xf4   :  { %4523 = vmatpush3.xpose.msra.mxu0 %v2888_v40  ;;  %4524 = vmatprep.mubr.msk.f32.mxu0 %vm4718_vm1, %v4717_v0 }
  0xf5   :  { %4527 = vmatprep.subr.mxu0 %v4717_v0 }
  0xf7   :  { %4550 = vmatmul.mubr.f32.vlgmr.msra.gmra.mrb[42].mxu1 %v3341_v45 }
  0xf8   :  { %4553 = vmatpush3.xpose.msra.mxu1 %v3341_v45  ;;  %4554 = vmatprep.mubr.msk.f32.mxu1 %vm4718_vm1, %v4717_v0 }
  0xf9   :  { %4557 = vmatprep.subr.mxu1 %v4717_v0 }
  0xfb   :  { %4525 = vmatmul.mubr.f32.vlgmr.msra.gmra.mrb[30].mxu0 %v2821_v36 }
  0xfc   :  { %4528 = vmatpush3.xpose.msra.mxu0 %v2821_v36  ;;  %4529 = vmatprep.mubr.msk.f32.mxu0 %vm4718_vm1, %v4717_v0 }
  0xfd   :  { %4562 = vmatprep.subr.mxu0 %v4717_v0 }
  0xff   :  { %4555 = vmatmul.mubr.f32.vlgmr.msra.gmra.mrb[42].mxu1 %v3274_v41 }
 0x100   :  { %4558 = vmatpush3.xpose.msra.mxu1 %v3274_v41  ;;  %4559 = vmatprep.mubr.msk.f32.mxu1 %vm4718_vm1, %v4717_v0 }
 0x103   :  { %4530 = vmatmul.mubr.f32.vlgmr.msra.gmra.mrb[30].mxu0 %v2821_v36 }
 0x104   :  { %4563 = vmatpush3.xpose.msra.mxu0 %v5045_v50  ;;  %4564 = vmatprep.mubr.msk.f32.mxu0 %vm4718_vm1, %v4717_v0 }
 0x105   :  { %4567 = vmatprep.subr.mxu0 %v4717_v0 }
 0x107   :  { %4560 = vmatmul.mubr.f32.vlgmr.msra.gmra.mrb[42].mxu1 %v3274_v41  ;;  %4565 = vmatmul.mubr.f32.vlgmr.msra.gmra.mrb[32].mxu0 %v3796_v54 }
 0x108   :  { %4568 = vmatpush3.xpose.msra.mxu0 %v3796_v54  ;;  %4569 = vmatprep.mubr.msk.f32.mxu0 %vm4718_vm1, %v4717_v0 }
 0x109   :  { %4572 = vmatprep.subr.mxu0 %v4717_v0 }
 0x10f   :  { %4570 = vmatmul.mubr.f32.vlgmr.msra.gmra.mrb[32].mxu0 %v5045_v50 }
 0x110   :  { %4573 = vmatpush3.xpose.msra.mxu0 %v3793_v51  ;;  %4574 = vmatprep.mubr.msk.f32.mxu0 %vm4718_vm1, %v4717_v0 }
 0x111   :  { %4577 = vmatprep.subr.mxu0 %v4717_v0 }
 0x115   :  { %v145_v55 = vpop.f32.mrb[0].mxu1  ;;  %v598_v56 = vpop.f32.mrb[0].mxu0 }
 0x116   :  { %v4326_v57 = vpop.f32.mrb[1].mxu1  ;;  %v4356_v58 = vpop.f32.mrb[1].mxu0 }
 0x117   :  { %4575 = vmatmul.mubr.f32.vlgmr.msra.gmra.mrb[32].mxu0 %v3793_v51 }
 0x118   :  { %4578 = vmatpush3.xpose.msra.mxu0 %v5045_v50  ;;  %4579 = vmatprep.mubr.msk.f32.mxu0 %vm4718_vm1, %v4717_v0 }
 0x119   :  { %4582 = vmatprep.subr.mxu0 %v4717_v0  ;;  %v221_v59 = vpop.f32.mrb[2].mxu1 }
 0x11a   :  { %v222_v60 = vadd.f32 %v221_v59, %v145_v55  ;;  %v4331_v61 = vpop.f32.mrb[3].mxu1 }
 0x11b   :  { %v748_v62 = vpop.f32.mrb[2].mxu0 }
 0x11c   :  { %v4366_v63 = vpop.f32.mrb[3].mxu0 }
 0x11d   :  { %v295_v1 = vpop.f32.mrb[4].mxu1 }
 0x11e   :  { %v296_v2 = vadd.f32 %v295_v1, %v222_v60  ;;  %v4336_v3 = vpop.f32.mrb[5].mxu1 }
 0x11f   :  { %4580 = vmatmul.mubr.f32.vlgmr.msra.gmra.mrb[32].mxu0 %v3794_v52  ;;  %v896_v4 = vpop.f32.mrb[4].mxu0 }
 0x120   :  { %4583 = vmatpush3.xpose.msra.mxu0 %v3794_v52  ;;  %4584 = vmatprep.mubr.msk.f32.mxu0 %vm4718_vm1, %v4717_v0  ;;  %v4376_v5 = vpop.f32.mrb[5].mxu0 }
 0x121   :  { %4587 = vmatprep.subr.mxu0 %v4717_v0  ;;  %v369_v6 = vpop.f32.mrb[6].mxu1 }
 0x122   :  { %v370_v7 = vadd.f32 %v369_v6, %v296_v2  ;;  %v4341_v8 = vpop.f32.mrb[7].mxu1 }
 0x123   :  { %v1050_v9 = vpop.f32.mrb[6].mxu0 }
 0x124   :  { %v4386_v10 = vpop.f32.mrb[7].mxu0 }
 0x125   :  { %v443_v11 = vpop.f32.mrb[8].mxu1 }
 0x126   :  { %v444_v12 = vadd.f32 %v443_v11, %v370_v7  ;;  %v4346_v13 = vpop.f32.mrb[9].mxu1 }
 0x127   :  { %4585 = vmatmul.mubr.f32.vlgmr.msra.gmra.mrb[32].mxu0 %v5045_v50  ;;  %v1200_v14 = vpop.f32.mrb[8].mxu0 }
 0x128   :  { %4588 = vmatpush3.xpose.msra.mxu0 %v5045_v50  ;;  %4589 = vmatprep.mubr.msk.f32.mxu0 %vm4718_vm1, %v4717_v0  ;;  %v4396_v15 = vpop.f32.mrb[9].mxu0 }
 0x129   :  { %v515_v17 = vpop.f32.mrb[10].mxu1 }
 0x12a   :  { %v516_v18 = vadd.f32 %v515_v17, %v444_v12  ;;  %v4351_v19 = vpop.f32.mrb[11].mxu1 }
 0x12b   :  { %v1348_v20 = vpop.f32.mrb[10].mxu0 }
 0x12c   :  { %v519_v21 = vadd.f32 %v516_v18, %v68_v16  ;;  %v4406_v22 = vpop.f32.mrb[11].mxu0 }
 0x12d   :  { %v674_v23 = vpop.f32.mrb[12].mxu1 }
 0x12e   :  { %521 = vst.msk [vmem:[#allocation2] sm:$0xff] %vm54_vm3, %v519_v21  ;;  %v675_v24 = vadd.f32 %v674_v23, %v598_v56  ;;  %v4361_v25 = vpop.f32.mrb[13].mxu1 }
 0x12f   :  { %4590 = vmatmul.mubr.f32.vlgmr.msra.gmra.mrb[32].mxu0 %v5045_v50  ;;  %v1499_v26 = vpop.f32.mrb[12].mxu0 }
 0x130   :  { %v749_v27 = vadd.f32 %v748_v62, %v675_v24  ;;  %v4416_v28 = vpop.f32.mrb[13].mxu0  ;;  %v1875_v24 = vld [vmem:[#allocation6] sm:$0xff] }
 0x131   :  { %v822_v29 = vpop.f32.mrb[14].mxu1 }
 0x132   :  { %v823_v0 = vadd.f32 %v822_v29, %v749_v27  ;;  %v4371_v30 = vpop.f32.mrb[15].mxu1 }
 0x133   :  { %v1649_v31 = vpop.f32.mrb[14].mxu0 }
 0x134   :  { %v897_v32 = vadd.f32 %v896_v4, %v823_v0  ;;  %v4426_v33 = vpop.f32.mrb[15].mxu0 }
 0x135   :  { %v968_v35 = vpop.f32.mrb[16].mxu1 }
 0x136   :  { %v969_v36 = vadd.f32 %v968_v35, %v897_v32  ;;  %v4381_v37 = vpop.f32.mrb[17].mxu1 }
 0x137   :  { %v1797_v38 = vpop.f32.mrb[16].mxu0 }
 0x138   :  { %v972_v39 = vadd.f32 %v969_v36, %v522_v34  ;;  %v4436_v40 = vpop.f32.mrb[17].mxu0  ;;  %v2324_v36 = vld [vmem:[#allocation7] sm:$0xff] }
 0x139   :  { %v1126_v41 = vpop.f32.mrb[18].mxu1 }
 0x13a   :  { %973 = vst.msk [vmem:[#allocation3] sm:$0xff] %vm54_vm3, %v972_v39  ;;  %v1127_v42 = vadd.f32 %v1126_v41, %v1050_v9  ;;  %v4391_v43 = vpop.f32.mrb[19].mxu1  ;;  %v1426_v9 = vld [vmem:[#allocation5] sm:$0xff]  ;;  %v2795_v41 = vlaneseq }
 0x13b   :  { %v1948_v44 = vpop.f32.mrb[18].mxu0 }
 0x13c   :  { %v1201_v45 = vadd.f32 %v1200_v14, %v1127_v42  ;;  %v4446_v46 = vpop.f32.mrb[19].mxu0 }
 0x13d   :  { %v1274_v47 = vpop.f32.mrb[20].mxu1 }
 0x13e   :  { %v1275_v48 = vadd.f32 %v1274_v47, %v1201_v45  ;;  %v4401_v49 = vpop.f32.mrb[21].mxu1  ;;  %v2798_v45 = vand.u32 127, %v2795_v41 }
 0x13f   :  { %v2098_v50 = vpop.f32.mrb[20].mxu0 }
 0x140   :  { %v1349_v51 = vadd.f32 %v1348_v20, %v1275_v48  ;;  %v4456_v52 = vpop.f32.mrb[21].mxu0 }
 0x141   :  { %v1420_v54 = vpop.f32.mrb[22].mxu1 }
 0x142   :  { %v1421_v55 = vadd.f32 %v1420_v54, %v1349_v51  ;;  %v4411_v56 = vpop.f32.mrb[23].mxu1 }
 0x143   :  { %v2246_v57 = vpop.f32.mrb[22].mxu0 }
 0x144   :  { %v1424_v58 = vadd.f32 %v1421_v55, %v974_v53  ;;  %v4466_v59 = vpop.f32.mrb[23].mxu0 }
 0x145   :  { %v1575_v60 = vpop.f32.mrb[24].mxu1 }
 0x146   :  { %1425 = vst.msk [vmem:[#allocation4] sm:$0xff] %vm54_vm3, %v1424_v58  ;;  %v1576_v61 = vadd.f32 %v1575_v60, %v1499_v26  ;;  %v4421_v62 = vpop.f32.mrb[25].mxu1  ;;  %v3719_v58 = vld [vmem:[#allocation3] sm:$0xff] }
 0x147   :  { %v2397_v63 = vpop.f32.mrb[24].mxu0 }
 0x148   :  { %v1650_v1 = vadd.f32 %v1649_v31, %v1576_v61  ;;  %v4476_v2 = vpop.f32.mrb[25].mxu0 }
 0x149   :  { %v1723_v3 = vpop.f32.mrb[26].mxu1 }
 0x14a   :  { %v1724_v4 = vadd.f32 %v1723_v3, %v1650_v1  ;;  %v4431_v5 = vpop.f32.mrb[27].mxu1 }
 0x14b   :  { %v2547_v6 = vpop.f32.mrb[26].mxu0 }
 0x14c   :  { %v1798_v7 = vadd.f32 %v1797_v38, %v1724_v4  ;;  %v4486_v8 = vpop.f32.mrb[27].mxu0 }
 0x14d   :  { %v1869_v10 = vpop.f32.mrb[28].mxu1  ;;  %v4172_v3 = vld [vmem:[#allocation4] sm:$0xff] }
 0x14e   :  { %v1870_v11 = vadd.f32 %v1869_v10, %v1798_v7  ;;  %v4441_v12 = vpop.f32.mrb[29].mxu1 }
 0x14f   :  { %v2695_v13 = vpop.f32.mrb[28].mxu0 }
 0x150   :  { %v1873_v14 = vadd.f32 %v1870_v11, %v1426_v9  ;;  %v4496_v15 = vpop.f32.mrb[29].mxu0 }
 0x151   :  { %v2024_v16 = vpop.f32.mrb[30].mxu1 }
 0x152   :  { %1874 = vst.msk [vmem:[#allocation5] sm:$0xff] %vm54_vm3, %v1873_v14  ;;  %v2025_v17 = vadd.f32 %v2024_v16, %v1948_v44  ;;  %v4451_v18 = vpop.f32.mrb[31].mxu1  ;;  %v2796_v44 = vshrl.u32 %v2795_v41, 7 }
 0x154   :  { %v2099_v19 = vadd.f32 %v2098_v50, %v2025_v17  ;;  %vm2804_vm4 = vcmp.eq.s32.totalorder %v2796_v44, %v2798_v45 }
 0x155   :  { %v2172_v20 = vpop.f32.mrb[32].mxu1 }
 0x156   :  { %v2173_v21 = vadd.f32 %v2172_v20, %v2099_v19  ;;  %v4461_v22 = vpop.f32.mrb[33].mxu1 }
 0x158   :  { %v2247_v23 = vadd.f32 %v2246_v57, %v2173_v21  ;;  %v3266_v57 = vld [vmem:[#allocation2] sm:$0xff] }
 0x159   :  { %v2318_v25 = vpop.f32.mrb[34].mxu1  ;;  %v2799_v42 = vld [vmem:[#allocation5] sm:$0xff] }
 0x15a   :  { %v2319_v26 = vadd.f32 %v2318_v25, %v2247_v23  ;;  %v4471_v27 = vpop.f32.mrb[35].mxu1 }
 0x15c   :  { %v2322_v28 = vadd.f32 %v2319_v26, %v1875_v24 }
 0x15d   :  { %v2473_v29 = vpop.f32.mrb[36].mxu1 }
 0x15e   :  { %2323 = vst.msk [vmem:[#allocation6] sm:$0xff] %vm54_vm3, %v2322_v28  ;;  %v2474_v0 = vadd.f32 %v2473_v29, %v2397_v63  ;;  %v4481_v30 = vpop.f32.mrb[37].mxu1 }
 0x160   :  { %v2548_v31 = vadd.f32 %v2547_v6, %v2474_v0 }
 0x161   :  { %v2621_v32 = vpop.f32.mrb[38].mxu1 }
 0x162   :  { %v2622_v33 = vadd.f32 %v2621_v32, %v2548_v31  ;;  %v4491_v34 = vpop.f32.mrb[39].mxu1 }
 0x164   :  { %v2696_v35 = vadd.f32 %v2695_v13, %v2622_v33 }
 0x165   :  { %v2767_v37 = vpop.f32.mrb[40].mxu1  ;;  %v2800_v43 = vld [vmem:[#allocation6] sm:$0xff] }
 0x166   :  { %v2768_v38 = vadd.f32 %v2767_v37, %v2696_v35  ;;  %v4501_v39 = vpop.f32.mrb[41].mxu1  ;;  %v2801_v46 = vadd.f32 %v2800_v43, %v2799_v42 }
 0x168   :  { %v2771_v40 = vadd.f32 %v2768_v38, %v2324_v36 }
 0x16a   :  { %2772 = vst.msk [vmem:[#allocation7] sm:$0xff] %vm54_vm3, %v2771_v40 }
 0x171   :  { %v2802_v47 = vld [vmem:[#allocation7] sm:$0xff] }
 0x172   :  { %v2803_v48 = vadd.f32 %v2802_v47, %v2801_v46 }
 0x174   :  { %v2805_v49 = vsel %vm2804_vm4, %v2803_v48, 0.0 }
 0x175   :  { %v2806_v50 = vsel %vm54_vm3, %v2805_v49, 0.0 }
 0x176   :  { %2807 = vadd.xlane.f32.xlu1 %v2806_v50 }
 0x1d6   :  { %v3262_v51 = vpop.f32.mrb[30].mxu0 }
 0x1d7   :  { %v4531_v52 = vpop.f32.mrb[31].mxu0  ;;  %v3267_v53 = vmul.f32 0.03125, %v3262_v51 }
 0x1d9   :  { %v3268_v59 = vsub.f32 %v3266_v57, %v3267_v53 }
 0x1da   :  { %v3715_v54 = vpop.f32.mrb[42].mxu1 }
 0x1db   :  { %v3720_v55 = vmul.f32 0.03125, %v3715_v54  ;;  %v4561_v56 = vpop.f32.mrb[43].mxu1 }
 0x1dd   :  { %v3721_v60 = vsub.f32 %v3719_v58, %v3720_v55 }
 0x1df   :  { %v4175_v61 = vmul.f32 %v3721_v60, %v3268_v59 }
 0x202   :  { %v4168_v62 = vpop.f32.mrb[32].mxu0 }
 0x203   :  { %v4173_v63 = vmul.f32 0.03125, %v4168_v62  ;;  %v4591_v1 = vpop.f32.mrb[33].mxu0  ;;  %v2808_v2 = vpop.xlane.xlu1 %2807 }
 0x204   :  { %v2809_v4 = vrot.slane %v2808_v2, 4 }
 0x205   :  { %v4174_v5 = vsub.f32 %v4172_v3, %v4173_v63 }
 0x206   :  { %v2810_v6 = vadd.f32 %v2809_v4, %v2808_v2 }
 0x207   :  { %v4176_v7 = vmul.f32 %v4174_v5, %v3268_v59  ;;  %v4178_v8 = vmul.f32 %v4174_v5, %v3721_v60 }
 0x208   :  { %v2811_v9 = vrot.slane %v2810_v6, 2 }
 0x209   :  { %v4177_v10 = vadd.f32 %v4176_v7, %v4175_v61 }
 0x20a   :  { %v2812_v11 = vadd.f32 %v2811_v9, %v2810_v6 }
 0x20b   :  { %v4179_v12 = vadd.f32 %v4178_v8, %v4177_v10 }
 0x20c   :  { %v2813_v13 = vrot.slane %v2812_v11, 1 }
 0x20d   :  { %v4180_v14 = vsel %vm54_vm3, %v4179_v12, 0.0 }
 0x20e   :  { %4181 = vadd.xlane.f32.xlu0 %v4180_v14  ;;  %v2814_v15 = vadd.f32 %v2813_v13, %v2812_v11 }
 0x210   :  { %4622 = vpush %v2814_v15 }
 0x241   :  { %s4623_s2 = spop %4622 }
 0x29b   :  { %v4182_v16 = vpop.xlane.xlu0 %4181 }
 0x29c   :  { %v4183_v17 = vrot.slane %v4182_v16, 4 }
 0x29e   :  { %v4184_v18 = vadd.f32 %v4183_v17, %v4182_v16 }
 0x2a0   :  { %v4185_v19 = vrot.slane %v4184_v18, 2 }
 0x2a2   :  { %v4186_v20 = vadd.f32 %v4185_v19, %v4184_v18 }
 0x2a4   :  { %v4187_v21 = vrot.slane %v4186_v20, 1 }
 0x2a6   :  { %v4188_v22 = vadd.f32 %v4187_v21, %v4186_v20 }
 0x2a8   :  { %4624 = vpush %v4188_v22 }
 0x2d9   :  { %s4625_s19 = spop %4624 }
 0x2da   :  { %s4190_s20 = smul.f32 0.5, %s4625_s19 }
 0x2dc   :  { %s4191_s21 = smul.f32 0.032258064, %s4190_s20 }
 0x2de   :  { %s4192_s22 = smul.f32 0.032258064, %s4191_s21 }
 0x2e0   :  { %s4193_s23 = ssub.f32 %s4623_s2, %s4192_s22 }
 0x2e2   :  { %s4194_s24 = smul.f32 0.125, %s4193_s23 }
 0x2e4   :  { %s4195_s25 = ssub.f32 0.0, %s4194_s24 }
 0x2e6   :  { %s4196_s26 = smul.f32 0.125, %s4195_s25 }
 0x2e8   :  { %4198 = sst [smem:[#allocation17]] %s4196_s26 }
 0x2e9   :  { %4707 = shalt.err (!%p4704_p12)
}
 0x2ea   :  { %s4719_s1 = smov [#allocation17]  }
 0x2eb   :  { %4206 = dma.smem_to_hbm %s4719_s1, 16, %s5102_s3, [#allocation13]  }
 0x2ec   :  { %4712 = dma.done.wait [#allocation13], 16  }
 0x2ed   :  { %4713 = vsyncadd [#allocation13], 4294967280 }
 0x2ee   :  { %4210 = sfence }
 0x2ef   :  { %4211 = vsyncpa [#allocation12], 1 }
 0x2f0   :  { %4212 = vsyncpa [#allocation15], 1 }
 0x2f1   :  { %4213 = vsyncpa [#allocation13], 1 }

</bundles_post_ra>
